<compile_context>
chip_gen: v7x
topology: tpu7x:2x2x1
jax: 0.10.0
libtpu: 0.0.40
codegen_flags: <defaults>
</compile_context>

<pallas_src>
import jax
import jax.numpy as jnp
from jax.experimental import pallas as pl
from jax.experimental.pallas import tpu as pltpu


# ----------------------------------------------------------------------------
# Kernels
# ----------------------------------------------------------------------------

def _net_encoder_packed_kernel(x_ref, adj_ref,
                               wi_ref, bi_ref, w1_ref, b1_ref, w2_ref, b2_ref,
                               node_ref, graph_ref, dense_ref):
    """Small-N path: adj_ref is the block-diagonal A_hat of shape (M, M),
    M = BB*N, so every contraction is a single flat 2-D MXU matmul."""
    M, _F = x_ref.shape
    D = wi_ref.shape[1]
    BB = graph_ref.shape[0]
    N = M // BB
    cdt = x_ref.dtype                           # MXU operand dtype (bf16 / f32)

    adj = adj_ref[...]                          # (M, M), resident for the step

    # init_lin: [M, F] @ [F, D] + b   (f32 accumulation)
    h0 = jnp.dot(x_ref[...], wi_ref[...],
                 preferred_element_type=jnp.float32) + bi_ref[...]
    # Park h0 in the dense output block -> frees its live f32 range during the
    # two GCN layers; the epilogue adds h2 + g on top.
    dense_ref[...] = h0.astype(dense_ref.dtype)

    # GCN layer 0: A_hat (h0 W1) + b1, leaky_relu(0.01) in f32
    t1 = jnp.dot(h0.astype(cdt), w1_ref[...], preferred_element_type=jnp.float32)
    h1 = jnp.dot(adj, t1.astype(cdt), preferred_element_type=jnp.float32) + b1_ref[...]
    h1 = jnp.where(h1 > 0, h1, 0.01 * h1)

    # GCN layer 1 (last layer -> no activation / norm / dropout)
    t2 = jnp.dot(h1.astype(cdt), w2_ref[...], preferred_element_type=jnp.float32)
    h2 = jnp.dot(adj, t2.astype(cdt), preferred_element_type=jnp.float32) + b2_ref[...]

    node_ref[...] = h2.astype(node_ref.dtype)

    # mean graph pooling (sublane-only reshape, lane dim D unchanged)
    g = jnp.mean(h2.reshape(BB, N, D), axis=1)          # (BB, D) f32
    graph_ref[...] = g.astype(graph_ref.dtype)

    # fused epilogue: dense = h0 (already parked) + h2 + g
    g_nodes = jnp.broadcast_to(g[:, None, :], (BB, N, D)).reshape(M, D)
    dense_ref[...] = (dense_ref[...].astype(jnp.float32) + h2 + g_nodes
                      ).astype(dense_ref.dtype)


def _net_encoder_batched_kernel(x_ref, adj_ref,
                                wi_ref, bi_ref, w1_ref, b1_ref, w2_ref, b2_ref,
                                node_ref, graph_ref, dense_ref):
    """Fallback for large N: per-graph (N,N)@(N,D) adjacency einsum."""
    BB, N, _F = x_ref.shape
    D = wi_ref.shape[1]
    M = BB * N
    cdt = x_ref.dtype

    adj = adj_ref[...]                          # (BB, N, N)

    h0 = jnp.dot(x_ref[...].reshape(M, _F), wi_ref[...],
                 preferred_element_type=jnp.float32) + bi_ref[...]
    dense_ref[...] = h0.astype(dense_ref.dtype)         # park h0

    t1 = jnp.dot(h0.astype(cdt), w1_ref[...], preferred_element_type=jnp.float32)
    # TODO(synk): K-tile this dense-adjacency contraction (grid axis marked
    # "arbitrary" + f32 VMEM accumulator) for very large N on v7x.
    h1 = jnp.einsum("bnm,bmd->bnd", adj, t1.reshape(BB, N, D).astype(cdt),
                    preferred_element_type=jnp.float32) + b1_ref[...]
    h1 = jnp.where(h1 > 0, h1, 0.01 * h1)

    t2 = jnp.dot(h1.reshape(M, D).astype(cdt), w2_ref[...],
                 preferred_element_type=jnp.float32)
    h2 = jnp.einsum("bnm,bmd->bnd", adj, t2.reshape(BB, N, D).astype(cdt),
                    preferred_element_type=jnp.float32) + b2_ref[...]

    h2_flat = h2.reshape(M, D)
    node_ref[...] = h2_flat.astype(node_ref.dtype)

    g = jnp.mean(h2, axis=1)                             # (BB, D) f32
    graph_ref[...] = g.astype(graph_ref.dtype)

    g_nodes = jnp.broadcast_to(g[:, None, :], (BB, N, D)).reshape(M, D)
    dense_ref[...] = (dense_ref[...].astype(jnp.float32) + h2_flat + g_nodes
                      ).astype(dense_ref.dtype)


# ----------------------------------------------------------------------------
# Chunking / VMEM budgeting
# ----------------------------------------------------------------------------

def _block_vmem_bytes(bb, N, F, D, itemsize, packed):
    """Rough per-step VMEM estimate (double-buffered blocks + live f32 set)."""
    m = bb * N
    adj = (m * m) if packed else (bb * N * N)
    inputs = 2 * (m * F + adj) * itemsize        # double-buffered input blocks
    acts = 6 * m * D * 4                         # live f32 intermediates
    outs = 2 * (2 * m * D + bb * D) * 4          # double-buffered output blocks
    return inputs + acts + outs


def _choose_graphs_per_step(B, N, F, D, itemsize, *, m_target=256,
                            vmem_budget=40 << 20, min_chunks=1):
    """Smallest divisor of B whose flat matmul M-dim (BB*N) fills the MXU
    (>= m_target rows) while the block fits the VMEM budget; else the largest
    fitting divisor.  Divisors only -> no batch padding needed."""
    divisors = [d for d in range(1, B + 1) if B % d == 0]
    ok = [d for d in divisors
          if (B // d) >= min_chunks
          and _block_vmem_bytes(d, N, F, D, itemsize, packed=False) <= vmem_budget]
    if not ok:
        return 1
    for d in ok:
        if d * N >= m_target:
            return d
    return ok[-1]


# ----------------------------------------------------------------------------
# Wrapper
# ----------------------------------------------------------------------------

def net_encoder_forward(x, adj_norm, params, *, matmul_dtype=jnp.bfloat16,
                        out_dtype=jnp.float32, num_chunks=None,
                        adj_mode="auto", min_chunks=1):
    """x: [B, N, F] float32, adj_norm: [B, N, N] float32 (GCN-normalized).

    matmul_dtype: MXU operand dtype (default bf16 on all generations; f32 for
      exact-match).  Accumulation / activations / pooling stay f32.
    min_chunks: set to 2 on v7x so both TensorCores get a "parallel" grid step.
    """
    B, N, F_dim = x.shape
    D = params["wi"].shape[1]
    itemsize = jnp.dtype(matmul_dtype).itemsize

    if num_chunks is None:
        BB = _choose_graphs_per_step(B, N, F_dim, D, itemsize,
                                     min_chunks=min_chunks)
        num_chunks = B // BB
    else:
        assert B % num_chunks == 0, "num_chunks must divide B"
        BB = B // num_chunks
    M = BB * N

    # Packed (block-diagonal) adjacency only when the blow-up is tiny.
    if adj_mode == "auto":
        packed = (N <= 128) and (M * M * itemsize <= (4 << 20))
    else:
        packed = (adj_mode == "packed")

    # Casts are no-ops if callers already provide matmul_dtype; reshapes are
    # free views because num_chunks divides B (no padding).
    adj_c = adj_norm.astype(matmul_dtype).reshape(num_chunks, BB, N, N)
    if packed:
        if BB == 1:
            adj_in = adj_c.reshape(num_chunks, M, M)
        else:
            eye = jnp.eye(BB, dtype=matmul_dtype)
            adj_in = (adj_c[:, :, :, None, :] * eye[None, :, None, :, None]
                      ).reshape(num_chunks, M, M)
        x_in = x.astype(matmul_dtype).reshape(num_chunks, M, F_dim)
        adj_spec = pl.BlockSpec((None, M, M), lambda c: (c, 0, 0))
        x_spec = pl.BlockSpec((None, M, F_dim), lambda c: (c, 0, 0))
        kernel = _net_encoder_packed_kernel
    else:
        adj_in = adj_c
        x_in = x.astype(matmul_dtype).reshape(num_chunks, BB, N, F_dim)
        adj_spec = pl.BlockSpec((None, BB, N, N), lambda c: (c, 0, 0, 0))
        x_spec = pl.BlockSpec((None, BB, N, F_dim), lambda c: (c, 0, 0, 0))
        kernel = _net_encoder_batched_kernel

    wi = params["wi"].astype(matmul_dtype)
    w1 = params["w1"].astype(matmul_dtype)
    w2 = params["w2"].astype(matmul_dtype)
    bi = params["bi"].astype(jnp.float32)
    b1 = params["b1"].astype(jnp.float32)
    b2 = params["b2"].astype(jnp.float32)

    def const_spec(shape):
        # resident weights: constant index map -> DMA'd once
        return pl.BlockSpec(shape, lambda c, _s=shape: tuple(0 for _ in _s))

    out_shapes = (
        jax.ShapeDtypeStruct((num_chunks, M, D), out_dtype),    # node embeddings
        jax.ShapeDtypeStruct((num_chunks, BB, D), out_dtype),   # graph embeddings
        jax.ShapeDtypeStruct((num_chunks, M, D), out_dtype),    # dense epilogue
    )

    est = _block_vmem_bytes(BB, N, F_dim, D, itemsize, packed)
    vmem_limit = int(min(max(2 * est, 16 << 20), 48 << 20))   # headroom < v7x 64MiB

    node_out, graph_out, dense_out = pl.pallas_call(
        kernel,
        out_shape=out_shapes,
        grid_spec=pltpu.PrefetchScalarGridSpec(
            num_scalar_prefetch=0,
            grid=(num_chunks,),
            in_specs=[
                x_spec,
                adj_spec,
                const_spec((F_dim, D)),   # W_init
                const_spec((1, D)),       # b_init
                const_spec((D, D)),       # W1
                const_spec((1, D)),       # b1
                const_spec((D, D)),       # W2
                const_spec((1, D)),       # b2
            ],
            out_specs=[
                pl.BlockSpec((None, M, D), lambda c: (c, 0, 0)),
                pl.BlockSpec((None, BB, D), lambda c: (c, 0, 0)),
                pl.BlockSpec((None, M, D), lambda c: (c, 0, 0)),
            ],
        ),
        compiler_params=pltpu.CompilerParams(
            dimension_semantics=("parallel",),
            vmem_limit_bytes=vmem_limit,
        ),
    )(x_in, adj_in, wi, bi, w1, b1, w2, b2)

    # All wrapper reshapes below are free views (row-major compatible).
    node_embeddings = node_out.reshape(B * N, D)        # PyG-style flat nodes
    graph_embedding = graph_out.reshape(B, D)
    dense_emb = dense_out.reshape(B, N, D)
    net_mask = jnp.ones((B, N), dtype=bool)             # equal-sized graphs
    return node_embeddings, graph_embedding, dense_emb, net_mask


# ----------------------------------------------------------------------------
# Helpers: GCN normalization, synthetic params, pure-JAX reference
# ----------------------------------------------------------------------------

def gcn_normalize(adj):
    """A_hat = D^{-1/2} (A + I) D^{-1/2}, per graph. adj: [B, N, N]."""
    B, N, _ = adj.shape
    a = adj + jnp.eye(N, dtype=adj.dtype)[None]
    deg = jnp.sum(a, axis=-1)
    d_inv_sqrt = jnp.where(deg > 0, 1.0 / jnp.sqrt(deg), 0.0)
    return a * d_inv_sqrt[:, :, None] * d_inv_sqrt[:, None, :]


def init_params(key, net_feature_dim, embedding_dim):
    """Deterministic synthetic parameters (PyTorch-like uniform init bounds)."""
    ks = jax.random.split(key, 8)

    def lin(kw, kb, fan_in, fan_out):
        bound = 1.0 / jnp.sqrt(jnp.asarray(fan_in, jnp.float32))
        w = jax.random.uniform(kw, (fan_in, fan_out), jnp.float32, -bound, bound)
        b = jax.random.uniform(kb, (1, fan_out), jnp.float32, -bound, bound)
        return w, b

    wi, bi = lin(ks[0], ks[1], net_feature_dim, embedding_dim)
    w1, b1 = lin(ks[2], ks[3], embedding_dim, embedding_dim)
    w2, b2 = lin(ks[4], ks[5], embedding_dim, embedding_dim)
    return {"wi": wi, "bi": bi, "w1": w1, "b1": b1, "w2": w2, "b2": b2}


def _reference(x, adj_norm, p):
    """Pure-JAX reference for correctness check."""
    h0 = jnp.einsum("bnf,fd->bnd", x, p["wi"]) + p["bi"][None]
    h1 = jnp.einsum("bnm,bmd->bnd", adj_norm,
                    jnp.einsum("bnd,de->bne", h0, p["w1"])) + p["b1"][None]
    h1 = jnp.where(h1 > 0, h1, 0.01 * h1)
    h2 = jnp.einsum("bnm,bmd->bnd", adj_norm,
                    jnp.einsum("bnd,de->bne", h1, p["w2"])) + p["b2"][None]
    g = jnp.mean(h2, axis=1)
    dense = h2 + g[:, None, :] + h0
    return h2.reshape(-1, h2.shape[-1]), g, dense


# ----------------------------------------------------------------------------
# Demo / checks
# ----------------------------------------------------------------------------

if __name__ == "__main__":
    B, N, F_DIM, D = 2, 8, 4, 32   # batch, nodes/graph, net_feature_dim, embedding_dim

    key = jax.random.PRNGKey(0)
    k_x, k_a, k_p = jax.random.split(key, 3)

    x = jax.random.normal(k_x, (B, N, F_DIM), dtype=jnp.float32)
    # random symmetric 0/1 adjacency, no self loops
    raw = jax.random.uniform(k_a, (B, N, N))
    adj = (raw + jnp.swapaxes(raw, 1, 2) > 1.0).astype(jnp.float32)
    adj = adj * (1.0 - jnp.eye(N, dtype=jnp.float32)[None])
    adj_norm = gcn_normalize(adj)

    params = init_params(k_p, F_DIM, D)
    ref_node, ref_graph, ref_dense = _reference(x, adj_norm, params)

    # 1) Exact-match f32 MXU-operand config, packed (block-diagonal) adjacency.
    node_emb, graph_emb, dense_emb, net_mask = net_encoder_forward(
        x, adj_norm, params, matmul_dtype=jnp.float32)
    jax.block_until_ready((node_emb, graph_emb, dense_emb, net_mask))
    assert jnp.allclose(node_emb, ref_node, atol=1e-4, rtol=1e-4)
    assert jnp.allclose(graph_emb, ref_graph, atol=1e-4, rtol=1e-4)
    assert jnp.allclose(dense_emb, ref_dense, atol=1e-4, rtol=1e-4)
    assert net_mask.shape == (B, N) and bool(jnp.all(net_mask))

    # 2) Exact-match f32, batched-einsum fallback path (large-N code path).
    nb2, gb2, db2, _ = net_encoder_forward(x, adj_norm, params,
                                           matmul_dtype=jnp.float32,
                                           adj_mode="batched")
    jax.block_until_ready((nb2, gb2, db2))
    assert jnp.allclose(nb2, ref_node, atol=1e-4, rtol=1e-4)
    assert jnp.allclose(gb2, ref_graph, atol=1e-4, rtol=1e-4)
    assert jnp.allclose(db2, ref_dense, atol=1e-4, rtol=1e-4)

    # 3) Default perf config: bf16 MXU operands, f32 accumulation / outputs.
    nb, gb, db, _ = net_encoder_forward(x, adj_norm, params)
    jax.block_until_ready((nb, gb, db))
    assert bool(jnp.all(jnp.isfinite(db)))
    assert float(jnp.max(jnp.abs(db - ref_dense))) < 0.5

    print("KERNEL_OK")
</pallas_src>

<mosaic_0001>
module attributes {stable_mosaic.version = 11 : i64} {
  func.func @_net_encoder_packed_kernel(%arg0: i32, %arg1: memref<1x16x4xf32, #tpu.memory_space<vmem>>, %arg2: memref<1x16x16xf32, #tpu.memory_space<vmem>>, %arg3: memref<4x32xf32, #tpu.memory_space<vmem>>, %arg4: memref<1x32xf32, #tpu.memory_space<vmem>>, %arg5: memref<32x32xf32, #tpu.memory_space<vmem>>, %arg6: memref<1x32xf32, #tpu.memory_space<vmem>>, %arg7: memref<32x32xf32, #tpu.memory_space<vmem>>, %arg8: memref<1x32xf32, #tpu.memory_space<vmem>>, %arg9: memref<1x16x32xf32, #tpu.memory_space<vmem>>, %arg10: memref<1x2x32xf32, #tpu.memory_space<vmem>>, %arg11: memref<1x16x32xf32, #tpu.memory_space<vmem>>) attributes {dimension_semantics = [#tpu.dimension_semantics<parallel>], iteration_bounds = array<i64: 1>, scalar_prefetch = 0 : i64, scratch_operands = 0 : i64, tpu.core_type = #tpu.core_type<tc>, window_params = [{transform_indices = @transform_0, window_bounds = array<i64: 1, 16, 4>}, {transform_indices = @transform_1, window_bounds = array<i64: 1, 16, 16>}, {pipeline_mode = #tpu.pipeline_mode<synchronous>, transform_indices = @transform_2, window_bounds = array<i64: 4, 32>}, {pipeline_mode = #tpu.pipeline_mode<synchronous>, transform_indices = @transform_3, window_bounds = array<i64: 1, 32>}, {pipeline_mode = #tpu.pipeline_mode<synchronous>, transform_indices = @transform_4, window_bounds = array<i64: 32, 32>}, {pipeline_mode = #tpu.pipeline_mode<synchronous>, transform_indices = @transform_5, window_bounds = array<i64: 1, 32>}, {pipeline_mode = #tpu.pipeline_mode<synchronous>, transform_indices = @transform_6, window_bounds = array<i64: 32, 32>}, {pipeline_mode = #tpu.pipeline_mode<synchronous>, transform_indices = @transform_7, window_bounds = array<i64: 1, 32>}, {transform_indices = @transform_8, window_bounds = array<i64: 1, 16, 32>}, {transform_indices = @transform_9, window_bounds = array<i64: 1, 2, 32>}, {transform_indices = @transform_10, window_bounds = array<i64: 1, 16, 32>}]} {
    %c0 = arith.constant 0 : index
    %c0_0 = arith.constant 0 : index
    %c0_1 = arith.constant 0 : index
    %0 = vector.load %arg2[%c0, %c0_0, %c0_1] : memref<1x16x16xf32, #tpu.memory_space<vmem>>, vector<1x16x16xf32>
    %1 = vector.shape_cast %0 : vector<1x16x16xf32> to vector<16x16xf32>
    %c0_2 = arith.constant 0 : index
    %c0_3 = arith.constant 0 : index
    %c0_4 = arith.constant 0 : index
    %2 = vector.load %arg1[%c0_2, %c0_3, %c0_4] : memref<1x16x4xf32, #tpu.memory_space<vmem>>, vector<1x16x4xf32>
    %3 = vector.shape_cast %2 : vector<1x16x4xf32> to vector<16x4xf32>
    %c0_5 = arith.constant 0 : index
    %c0_6 = arith.constant 0 : index
    %4 = vector.load %arg3[%c0_5, %c0_6] : memref<4x32xf32, #tpu.memory_space<vmem>>, vector<4x32xf32>
    %cst = arith.constant dense<0.000000e+00> : vector<16x32xf32>
    %5 = tpu.matmul %3, %4, %cst {dimension_numbers = #tpu.dot_dimension_numbers<[1], [0], [0], [1], [0, 0, 1, 1], [], []>} : vector<16x4xf32>, vector<4x32xf32>, vector<16x32xf32> -> vector<16x32xf32>
    %c0_7 = arith.constant 0 : index
    %c0_8 = arith.constant 0 : index
    %6 = vector.load %arg4[%c0_7, %c0_8] : memref<1x32xf32, #tpu.memory_space<vmem>>, vector<1x32xf32>
    %7 = vector.broadcast %6 : vector<1x32xf32> to vector<16x32xf32>
    %8 = arith.addf %5, %7 : vector<16x32xf32>
    %c0_9 = arith.constant 0 : index
    %c0_10 = arith.constant 0 : index
    %c0_11 = arith.constant 0 : index
    %9 = vector.load %arg11[%c0_9, %c0_10, %c0_11] : memref<1x16x32xf32, #tpu.memory_space<vmem>>, vector<1x16x32xf32>
    %10 = vector.shape_cast %9 : vector<1x16x32xf32> to vector<16x32xf32>
    %11 = vector.shape_cast %8 : vector<16x32xf32> to vector<1x16x32xf32>
    tpu.vector_store %arg11[%c0_9, %c0_10, %c0_11], %11 {strides = array<i32>} : memref<1x16x32xf32, #tpu.memory_space<vmem>>, vector<1x16x32xf32>,
    %c0_12 = arith.constant 0 : index
    %c0_13 = arith.constant 0 : index
    %12 = vector.load %arg5[%c0_12, %c0_13] : memref<32x32xf32, #tpu.memory_space<vmem>>, vector<32x32xf32>
    %cst_14 = arith.constant dense<0.000000e+00> : vector<16x32xf32>
    %13 = tpu.matmul %8, %12, %cst_14 {dimension_numbers = #tpu.dot_dimension_numbers<[1], [0], [0], [1], [0, 0, 1, 1], [], []>} : vector<16x32xf32>, vector<32x32xf32>, vector<16x32xf32> -> vector<16x32xf32>
    %cst_15 = arith.constant dense<0.000000e+00> : vector<16x32xf32>
    %14 = tpu.matmul %1, %13, %cst_15 {dimension_numbers = #tpu.dot_dimension_numbers<[1], [0], [0], [1], [0, 0, 1, 1], [], []>} : vector<16x16xf32>, vector<16x32xf32>, vector<16x32xf32> -> vector<16x32xf32>
    %c0_16 = arith.constant 0 : index
    %c0_17 = arith.constant 0 : index
    %15 = vector.load %arg6[%c0_16, %c0_17] : memref<1x32xf32, #tpu.memory_space<vmem>>, vector<1x32xf32>
    %16 = vector.broadcast %15 : vector<1x32xf32> to vector<16x32xf32>
    %17 = arith.addf %14, %16 : vector<16x32xf32>
    %cst_18 = arith.constant 0.000000e+00 : f32
    %18 = vector.broadcast %cst_18 : f32 to vector<16x32xf32>
    %19 = arith.cmpf ogt, %17, %18 : vector<16x32xf32>
    %cst_19 = arith.constant 0.00999999977 : f32
    %20 = vector.broadcast %cst_19 : f32 to vector<16x32xf32>
    %21 = arith.mulf %20, %17 : vector<16x32xf32>
    %22 = arith.select %19, %17, %21 : vector<16x32xi1>, vector<16x32xf32>
    %c0_20 = arith.constant 0 : index
    %c0_21 = arith.constant 0 : index
    %23 = vector.load %arg7[%c0_20, %c0_21] : memref<32x32xf32, #tpu.memory_space<vmem>>, vector<32x32xf32>
    %cst_22 = arith.constant dense<0.000000e+00> : vector<16x32xf32>
    %24 = tpu.matmul %22, %23, %cst_22 {dimension_numbers = #tpu.dot_dimension_numbers<[1], [0], [0], [1], [0, 0, 1, 1], [], []>} : vector<16x32xf32>, vector<32x32xf32>, vector<16x32xf32> -> vector<16x32xf32>
    %cst_23 = arith.constant dense<0.000000e+00> : vector<16x32xf32>
    %25 = tpu.matmul %1, %24, %cst_23 {dimension_numbers = #tpu.dot_dimension_numbers<[1], [0], [0], [1], [0, 0, 1, 1], [], []>} : vector<16x16xf32>, vector<16x32xf32>, vector<16x32xf32> -> vector<16x32xf32>
    %c0_24 = arith.constant 0 : index
    %c0_25 = arith.constant 0 : index
    %26 = vector.load %arg8[%c0_24, %c0_25] : memref<1x32xf32, #tpu.memory_space<vmem>>, vector<1x32xf32>
    %27 = vector.broadcast %26 : vector<1x32xf32> to vector<16x32xf32>
    %28 = arith.addf %25, %27 : vector<16x32xf32>
    %c0_26 = arith.constant 0 : index
    %c0_27 = arith.constant 0 : index
    %c0_28 = arith.constant 0 : index
    %29 = vector.load %arg9[%c0_26, %c0_27, %c0_28] : memref<1x16x32xf32, #tpu.memory_space<vmem>>, vector<1x16x32xf32>
    %30 = vector.shape_cast %29 : vector<1x16x32xf32> to vector<16x32xf32>
    %31 = vector.shape_cast %28 : vector<16x32xf32> to vector<1x16x32xf32>
    tpu.vector_store %arg9[%c0_26, %c0_27, %c0_28], %31 {strides = array<i32>} : memref<1x16x32xf32, #tpu.memory_space<vmem>>, vector<1x16x32xf32>,
    %32 = vector.shape_cast %28 : vector<16x32xf32> to vector<2x8x32xf32>
    %cst_29 = arith.constant dense<0.000000e+00> : vector<2x32xf32>
    %33 = vector.multi_reduction <add>, %32, %cst_29 [1] : vector<2x8x32xf32> to vector<2x32xf32>
    %cst_30 = arith.constant 8.000000e+00 : f32
    %34 = vector.broadcast %cst_30 : f32 to vector<2x32xf32>
    %35 = arith.divf %33, %34 : vector<2x32xf32>
    %c0_31 = arith.constant 0 : index
    %c0_32 = arith.constant 0 : index
    %c0_33 = arith.constant 0 : index
    %36 = vector.load %arg10[%c0_31, %c0_32, %c0_33] : memref<1x2x32xf32, #tpu.memory_space<vmem>>, vector<1x2x32xf32>
    %37 = vector.shape_cast %36 : vector<1x2x32xf32> to vector<2x32xf32>
    %38 = vector.shape_cast %35 : vector<2x32xf32> to vector<1x2x32xf32>
    tpu.vector_store %arg10[%c0_31, %c0_32, %c0_33], %38 {strides = array<i32>} : memref<1x2x32xf32, #tpu.memory_space<vmem>>, vector<1x2x32xf32>,
    %39 = vector.shape_cast %35 : vector<2x32xf32> to vector<2x1x32xf32>
    %40 = vector.shape_cast %39 : vector<2x1x32xf32> to vector<2x1x32xf32>
    %41 = vector.broadcast %40 : vector<2x1x32xf32> to vector<2x8x32xf32>
    %42 = vector.shape_cast %41 : vector<2x8x32xf32> to vector<16x32xf32>
    %c0_34 = arith.constant 0 : index
    %c0_35 = arith.constant 0 : index
    %c0_36 = arith.constant 0 : index
    %43 = vector.load %arg11[%c0_34, %c0_35, %c0_36] : memref<1x16x32xf32, #tpu.memory_space<vmem>>, vector<1x16x32xf32>
    %44 = vector.shape_cast %43 : vector<1x16x32xf32> to vector<16x32xf32>
    %45 = arith.addf %44, %28 : vector<16x32xf32>
    %46 = arith.addf %45, %42 : vector<16x32xf32>
    %c0_37 = arith.constant 0 : index
    %c0_38 = arith.constant 0 : index
    %c0_39 = arith.constant 0 : index
    %47 = vector.load %arg11[%c0_37, %c0_38, %c0_39] : memref<1x16x32xf32, #tpu.memory_space<vmem>>, vector<1x16x32xf32>
    %48 = vector.shape_cast %47 : vector<1x16x32xf32> to vector<16x32xf32>
    %49 = vector.shape_cast %46 : vector<16x32xf32> to vector<1x16x32xf32>
    tpu.vector_store %arg11[%c0_37, %c0_38, %c0_39], %49 {strides = array<i32>} : memref<1x16x32xf32, #tpu.memory_space<vmem>>, vector<1x16x32xf32>,
    return
  }
  func.func @transform_0(%arg0: i32) -> (i32, i32, i32) {
    %c0_i32 = arith.constant 0 : i32
    %c0_i32_0 = arith.constant 0 : i32
    %c0_i32_1 = arith.constant 0 : i32
    return %arg0, %c0_i32, %c0_i32_0 : i32, i32, i32
  }
  func.func @transform_1(%arg0: i32) -> (i32, i32, i32) {
    %c0_i32 = arith.constant 0 : i32
    %c0_i32_0 = arith.constant 0 : i32
    %c0_i32_1 = arith.constant 0 : i32
    return %arg0, %c0_i32, %c0_i32_0 : i32, i32, i32
  }
  func.func @transform_2(%arg0: i32) -> (i32, i32) {
    %c0_i32 = arith.constant 0 : i32
    %c0_i32_0 = arith.constant 0 : i32
    %c0_i32_1 = arith.constant 0 : i32
    return %c0_i32, %c0_i32_0 : i32, i32
  }
  func.func @transform_3(%arg0: i32) -> (i32, i32) {
    %c0_i32 = arith.constant 0 : i32
    %c0_i32_0 = arith.constant 0 : i32
    %c0_i32_1 = arith.constant 0 : i32
    return %c0_i32, %c0_i32_0 : i32, i32
  }
  func.func @transform_4(%arg0: i32) -> (i32, i32) {
    %c0_i32 = arith.constant 0 : i32
    %c0_i32_0 = arith.constant 0 : i32
    %c0_i32_1 = arith.constant 0 : i32
    return %c0_i32, %c0_i32_0 : i32, i32
  }
  func.func @transform_5(%arg0: i32) -> (i32, i32) {
    %c0_i32 = arith.constant 0 : i32
    %c0_i32_0 = arith.constant 0 : i32
    %c0_i32_1 = arith.constant 0 : i32
    return %c0_i32, %c0_i32_0 : i32, i32
  }
  func.func @transform_6(%arg0: i32) -> (i32, i32) {
    %c0_i32 = arith.constant 0 : i32
    %c0_i32_0 = arith.constant 0 : i32
    %c0_i32_1 = arith.constant 0 : i32
    return %c0_i32, %c0_i32_0 : i32, i32
  }
  func.func @transform_7(%arg0: i32) -> (i32, i32) {
    %c0_i32 = arith.constant 0 : i32
    %c0_i32_0 = arith.constant 0 : i32
    %c0_i32_1 = arith.constant 0 : i32
    return %c0_i32, %c0_i32_0 : i32, i32
  }
  func.func @transform_8(%arg0: i32) -> (i32, i32, i32) {
    %c0_i32 = arith.constant 0 : i32
    %c0_i32_0 = arith.constant 0 : i32
    %c0_i32_1 = arith.constant 0 : i32
    return %arg0, %c0_i32, %c0_i32_0 : i32, i32, i32
  }
  func.func @transform_9(%arg0: i32) -> (i32, i32, i32) {
    %c0_i32 = arith.constant 0 : i32
    %c0_i32_0 = arith.constant 0 : i32
    %c0_i32_1 = arith.constant 0 : i32
    return %arg0, %c0_i32, %c0_i32_0 : i32, i32, i32
  }
  func.func @transform_10(%arg0: i32) -> (i32, i32, i32) {
    %c0_i32 = arith.constant 0 : i32
    %c0_i32_0 = arith.constant 0 : i32
    %c0_i32_1 = arith.constant 0 : i32
    return %arg0, %c0_i32, %c0_i32_0 : i32, i32, i32
  }
}

</mosaic_0001>

<bundles_post_ra>
// kernel: tpu_custom_call.1
= control target key start
LH: loop header
LB: loop body
LE: loop exit
PB: predicated region body
PF: predicated region fallthrough
CT: control target
= control target key end

     0   :  { %16 = vsyncpa [#allocation3], 0  ;;  %s1056_s0 = inlined_call_operand.vmem [shape: f32[1,16,4], index: 0, kind: input, shape index: {}]   ;;  %s1057_s1 = inlined_call_operand.hbm [shape: f32[1,16,16], index: 1, kind: input, shape index: {}]   ;;  %s1058_s2 = inlined_call_operand.hbm [shape: f32[4,32], index: 2, kind: input, shape index: {}]   ;;  %s1059_s3 = inlined_call_operand.vmem [shape: f32[1,32], index: 3, kind: input, shape index: {}]   ;;  %s1060_s4 = inlined_call_operand.vmem [shape: f32[32,32], index: 4, kind: input, shape index: {}]   ;;  %s1061_s5 = inlined_call_operand.vmem [shape: f32[1,32], index: 5, kind: input, shape index: {}]   ;;  %s1062_s6 = inlined_call_operand.hbm [shape: f32[32,32], index: 6, kind: input, shape index: {}]   ;;  %s1063_s7 = inlined_call_operand.vmem [shape: f32[1,32], index: 7, kind: input, shape index: {}]   ;;  %s1064_s8 = inlined_call_operand.hbm [shape: f32[1,16,32], index: 8, kind: output, shape index: {0}]   ;;  %s1065_s9 = inlined_call_operand.hbm [shape: f32[1,2,32], index: 9, kind: output, shape index: {1}]   ;;  %s1066_s10 = inlined_call_operand.hbm [shape: f32[1,16,32], index: 10, kind: output, shape index: {2}]  }
   0x1   :  { %17 = vsyncpa [#allocation6], 0 }
   0x2   :  { %18 = vsyncpa [#allocation4], 0 }
   0x3   :  { %19 = vsyncpa [#allocation10], 0  ;;  %s852_s13 = smov [#allocation5]   ;;  %s853_s15 = smov [#allocation2]  }
   0x4   :  { %s40_s14 = sshll.u32 %s852_s13, 4  ;;  %s27_s16 = sshll.u32 %s853_s15, 4  ;;  %s41_s14 = int_to_ptr.vmem [resolvable:$true] %s40_s14  ;;  %s915_s16 = int_to_ptr.vmem [resolvable:$true] %s27_s16 }
   0x5   :  { %s712_s19 = scalar_lea.hbm %s1058_s2, 64 }
   0x6   :  { %p713_p0 = scmp.ne.s32.totalorder %s1058_s2, %s712_s19  ;;  %p716_p1 = scmp.lt.u32.totalorder %s712_s19, %s1058_s2 }
   0x8   :  { %p718_p2 = pnand %p716_p1, %p713_p0 }
   0xa   :  { %721 = shalt.err (!%p718_p2)
}
   0xb   :  { %s722_s24 = scalar_lea.vmem %s41_s14, 64  ;;  %p727_p4 = scmp.lt.s32.totalorder %s41_s14, %s41_s14 }
   0xc   :  { %p723_p3 = scmp.ne.s32.totalorder %s41_s14, %s722_s24  ;;  %p728_p5 = scmp.lt.s32.totalorder %s722_s24, %s722_s24 }
   0xe   :  { %p729_p6 = por %p728_p5, %p727_p4 }
  0x10   :  { %p730_p7 = pnand %p729_p6, %p723_p3 }
  0x12   :  { %733 = shalt.err (!%p730_p7)
}
  0x13   :  { %43 = dma.hbm_to_vmem [thread:$0]  %s1058_s2, 64, %s41_s14, [#allocation6]  }
  0x14   :  { %s734_s29 = scalar_lea.hbm %s1057_s1, 256 }
  0x15   :  { %p735_p8 = scmp.ne.s32.totalorder %s1057_s1, %s734_s29  ;;  %p738_p9 = scmp.lt.u32.totalorder %s734_s29, %s1057_s1 }
  0x17   :  { %p740_p10 = pnand %p738_p9, %p735_p8 }
  0x19   :  { %743 = shalt.err (!%p740_p10)
}
  0x1a   :  { %s744_s15 = scalar_lea.vmem %s915_s16, 256  ;;  %p749_p12 = scmp.lt.s32.totalorder %s915_s16, %s915_s16 }
  0x1b   :  { %p745_p11 = scmp.ne.s32.totalorder %s915_s16, %s744_s15  ;;  %p750_p13 = scmp.lt.s32.totalorder %s744_s15, %s744_s15 }
  0x1d   :  { %p751_p0 = por %p750_p13, %p749_p12 }
  0x1f   :  { %p752_p1 = pnand %p751_p0, %p745_p11 }
  0x21   :  { %755 = shalt.err (!%p752_p1)
}
  0x22   :  { %s854_s2 = smov 128   ;;  %s855_s14 = smov 8  }
  0x23   :  { %33 = dma.hbm_to_vmem [thread:$0]  %s1057_s1, 256, %s915_s16, [#allocation3], %s854_s2, %s854_s2, %s855_s14  }
  0x24   :  { %s856_s19 = smov [#allocation7]   ;;  %s756_s23 = scalar_lea.hbm %s1062_s6, 512 }
  0x25   :  { %s55_s20 = sshll.u32 %s856_s19, 4  ;;  %p757_p2 = scmp.ne.s32.totalorder %s1062_s6, %s756_s23  ;;  %s56_s20 = int_to_ptr.vmem [resolvable:$true] %s55_s20 }
  0x26   :  { %p760_p3 = scmp.lt.u32.totalorder %s756_s23, %s1062_s6 }
  0x28   :  { %p762_p4 = pnand %p760_p3, %p757_p2 }
  0x2a   :  { %765 = shalt.err (!%p762_p4)
}
  0x2b   :  { %s766_s28 = scalar_lea.vmem %s56_s20, 512  ;;  %p771_p6 = scmp.lt.s32.totalorder %s56_s20, %s56_s20 }
  0x2c   :  { %p767_p5 = scmp.ne.s32.totalorder %s56_s20, %s766_s28  ;;  %p772_p7 = scmp.lt.s32.totalorder %s766_s28, %s766_s28 }
  0x2e   :  { %p773_p8 = por %p772_p7, %p771_p6 }
  0x30   :  { %p774_p9 = pnand %p773_p8, %p767_p5 }
  0x32   :  { %777 = shalt.err (!%p774_p9)
}
  0x33   :  { %61 = dma.hbm_to_vmem [thread:$0]  %s1062_s6, 512, %s56_s20, [#allocation6], %s854_s2, %s854_s2, %s855_s14  }
  0x34   :  { %844 = dma.done.wait [#allocation3], 256  }
  0x35   :  { %845 = vsyncadd [#allocation3], 4294967040 }
  0x36   :  { %846 = dma.done.wait [#allocation6], 576  }
  0x37   :  { %847 = vsyncadd [#allocation6], 4294966720  ;;  %vm92_vm0 = vcmask 1043456   ;;  %vm85_vm1 = vcmask 31744   ;;  %v77_v0 = vld [vmem:[#allocation5] sm:$0xf] }
  0x38   :  { %v75_v1 = vld [vmem:[%s1056_s0] sm:$0xff]  ;;  %v76_v2 = vld [vmem:[%s1056_s0 + $0x8] sm:$0xff]  ;;  %639 = vmatprep.subr.msk.mxu0 %vm92_vm0, %v77_v0  ;;  %v176_v6 = vld [vmem:[%s1060_s4 + $0x10] sm:$0xff]  ;;  %vm171_vm2 = vcmask 261120   ;;  %vm266_vm3 = vcmask 130048   ;;  %s857_s24 = smov [#allocation8]  }
  0x39   :  { %641 = vmatprep.mubr.msk.f32.mxu0 %vm85_vm1, %v75_v1  ;;  %v174_v3 = vld [vmem:[%s1060_s4] sm:$0xff]  ;;  %v175_v4 = vld [vmem:[%s1060_s4 + $0x8] sm:$0xff]  ;;  %640 = vmatpush3.msk.msra.mxu0 %vm92_vm0, %v77_v0  ;;  %v177_v7 = vld [vmem:[%s1060_s4 + $0x18] sm:$0xff]  ;;  %s560_s25 = sshll.u32 %s857_s24, 4  ;;  %s561_s25 = int_to_ptr.vmem [resolvable:$true] %s560_s25 }
  0x3a   :  { %v680_v5 = vpack.c.bf16 %v175_v4, %v174_v3  ;;  %642 = vmatmul.mubr.msk.f32.vlgmr.msra.gmra.mrb[0].mxu0 %vm85_vm1, %v76_v2  ;;  %v684_v8 = vpack.c.bf16 %v177_v7, %v176_v6  ;;  %v602_v9 = vld [vmem:[%s1059_s3] ss:$0 sm:$0xff]  ;;  %v74_v18 = vld [vmem:[#allocation2 + $0x8] sm:$0xff]  ;;  %v354_v19 = vld [vmem:[#allocation7] sm:$0xff]  ;;  %s778_s26 = scalar_lea.vmem %s561_s25, 256  ;;  %p783_p11 = scmp.lt.s32.totalorder %s561_s25, %s561_s25 }
  0x3b   :  { %v73_v14 = vld [vmem:[#allocation2] sm:$0xff]  ;;  %v357_v23 = vld [vmem:[#allocation7 + $0x18] sm:$0xff]  ;;  %p779_p10 = scmp.ne.s32.totalorder %s561_s25, %s778_s26  ;;  %p784_p12 = scmp.lt.s32.totalorder %s778_s26, %s778_s26 }
  0x3c   :  { %681 = vmatprep.subr.bf16.mxu1 %v680_v5  ;;  %659 = vmatprep.mubr.msk.f32.mxu0 %vm266_vm3, %v73_v14  ;;  %v355_v20 = vld [vmem:[#allocation7 + $0x8] sm:$0xff]  ;;  %v356_v22 = vld [vmem:[#allocation7 + $0x10] sm:$0xff] }
  0x3d   :  { %683 = vmatpush3.bf16.msra.mxu1 %v680_v5  ;;  %v692_v21 = vpack.c.bf16 %v355_v20, %v354_v19  ;;  %v696_v24 = vpack.c.bf16 %v357_v23, %v356_v22  ;;  %v608_v25 = vld [vmem:[%s1061_s5] ss:$0 sm:$0xff]  ;;  %p785_p13 = por %p784_p12, %p783_p11 }
  0x3e   :  { %685 = vmatprep.subr.bf16.mxu1 %v684_v8  ;;  %v613_v37 = vld [vmem:[%s1063_s7] ss:$0 sm:$0xff] }
  0x3f   :  { %p786_p0 = pnand %p785_p13, %p779_p10 }
  0x41   :  { %687 = vmatpush3.bf16.msra.mxu1 %v684_v8 }
 0x10d   :  { %v643_v10 = vpop.f32.mrb[0].mxu0 }
 0x10e   :  { %v168_v11 = vadd.f32 %v643_v10, %v602_v9  ;;  %v162_v12 = vpop.f32.mrb[1].mxu0 }
 0x10f   :  { %v163_v13 = vadd.f32 %v602_v9, %v162_v12 }
 0x110   :  { %173 = vst.msk [vmem:[#allocation11 + $0x8] sm:$0xff] %vm171_vm2, %v168_v11 }
 0x111   :  { %172 = vst.msk [vmem:[#allocation11] sm:$0xff] %vm171_vm2, %v163_v13  ;;  %652 = vmatprep.mubr.msk.f32.mxu1 %vm171_vm2, %v163_v13 }
 0x112   :  { %653 = vmatmul.mubr.msk.f32.vlgmr.msra.gmra.mrb[0].mxu1 %vm171_vm2, %v168_v11 }
 0x113   :  { %677 = vmatprep.mubr.msk.f32.mxu1 %vm266_vm3, %v73_v14 }
 0x1e5   :  { %v654_v15 = vpop.f32.mrb[0].mxu1 }
 0x1e6   :  { %v250_v16 = vpop.f32.mrb[1].mxu1 }
 0x1e7   :  { %v688_v17 = vpack.c.bf16 %v654_v15, %v250_v16 }
 0x1e9   :  { %689 = vmatprep.subr.bf16.mxu0 %v688_v17 }
 0x1ea   :  { %691 = vmatpush3.bf16.msra.mxu0 %v688_v17 }
 0x1eb   :  { %693 = vmatprep.subr.bf16.mxu0 %v692_v21 }
 0x1ed   :  { %660 = vmatmul.mubr.msk.f32.vlgmr.msra.gmra.mrb[2].mxu0 %vm266_vm3, %v74_v18 }
 0x1ee   :  { %695 = vmatpush3.bf16.msra.mxu0 %v692_v21 }
 0x1ef   :  { %697 = vmatprep.subr.bf16.mxu0 %v696_v24 }
 0x1f2   :  { %699 = vmatpush3.bf16.msra.mxu0 %v696_v24 }
 0x2c0   :  { %v661_v26 = vpop.f32.mrb[2].mxu0 }
 0x2c1   :  { %v345_v27 = vadd.f32 %v661_v26, %v608_v25  ;;  %v339_v28 = vpop.f32.mrb[3].mxu0 }
 0x2c2   :  { %v340_v29 = vadd.f32 %v608_v25, %v339_v28 }
 0x2c3   :  { %v351_v30 = vmul.f32 0.01, %v345_v27  ;;  %vm349_vm4 = vcmp.gt.f32.partialorder %v345_v27, 0.0 }
 0x2c4   :  { %vm348_vm5 = vcmp.gt.f32.partialorder %v340_v29, 0.0  ;;  %v350_v31 = vmul.f32 0.01, %v340_v29 }
 0x2c5   :  { %v353_v33 = vsel %vm349_vm4, %v345_v27, %v351_v30 }
 0x2c6   :  { %v352_v32 = vsel %vm348_vm5, %v340_v29, %v350_v31 }
 0x2c7   :  { %670 = vmatprep.mubr.msk.f32.mxu0 %vm171_vm2, %v352_v32 }
 0x2c8   :  { %671 = vmatmul.mubr.msk.f32.vlgmr.msra.gmra.mrb[4].mxu0 %vm171_vm2, %v353_v33 }
 0x39b   :  { %v672_v34 = vpop.f32.mrb[4].mxu0 }
 0x39c   :  { %v430_v35 = vpop.f32.mrb[5].mxu0 }
 0x39d   :  { %v700_v36 = vpack.c.bf16 %v672_v34, %v430_v35 }
 0x39f   :  { %701 = vmatprep.subr.bf16.mxu1 %v700_v36 }
 0x3a0   :  { %703 = vmatpush3.bf16.msra.mxu1 %v700_v36 }
 0x3a3   :  { %678 = vmatmul.mubr.msk.f32.vlgmr.msra.gmra.mrb[2].mxu1 %vm266_vm3, %v74_v18 }
 0x476   :  { %v679_v38 = vpop.f32.mrb[2].mxu1 }
 0x477   :  { %v518_v39 = vadd.f32 %v679_v38, %v613_v37  ;;  %v512_v40 = vpop.f32.mrb[3].mxu1 }
 0x478   :  { %v513_v41 = vadd.f32 %v613_v37, %v512_v40 }
 0x479   :  { %v530_v42 = vsel %vm171_vm2, %v518_v39, 0.0  ;;  %522 = vst.msk [vmem:[#allocation8 + $0x8] sm:$0xff] %vm171_vm2, %v518_v39 }
 0x47a   :  { %v531_v43 = vrot.slane %v530_v42, 4  ;;  %v523_v44 = vsel %vm171_vm2, %v513_v41, 0.0  ;;  %521 = vst.msk [vmem:[#allocation8] sm:$0xff] %vm171_vm2, %v513_v41 }
 0x47b   :  { %v524_v45 = vrot.slane %v523_v44, 4 }
 0x47c   :  { %789 = shalt.err (!%p786_p0)
}
 0x47d   :  { %s790_s28 = scalar_lea.hbm %s1064_s8, 256 }
 0x47e   :  { %p791_p1 = scmp.ne.s32.totalorder %s1064_s8, %s790_s28  ;;  %p794_p2 = scmp.lt.u32.totalorder %s790_s28, %s1064_s8 }
 0x480   :  { %p796_p3 = pnand %p794_p2, %p791_p1 }
 0x482   :  { %799 = shalt.err (!%p796_p3)
}
 0x483   :  { %566 = dma.vmem_to_hbm [thread:$0]  %s561_s25, 256, %s1064_s8, [#allocation4], %s854_s2, %s854_s2, %s855_s14   ;;  %v532_v46 = vadd.f32 %v531_v43, %v530_v42  ;;  %v525_v47 = vadd.f32 %v524_v45, %v523_v44  ;;  %v548_v55 = vld [vmem:[#allocation11 + $0x8] sm:$0xff]  ;;  %v547_v59 = vld [vmem:[#allocation11] sm:$0xff]  ;;  %vm542_vm6 = vcmask 1041409   ;;  %vm545_vm7 = vcmask 254976  }
 0x484   :  { %s858_s13 = smov [#allocation9]   ;;  %v550_v58 = vadd.f32 %v548_v55, %v518_v39  ;;  %s859_s6 = smov [#allocation11]   ;;  %v549_v61 = vadd.f32 %v547_v59, %v513_v41 }
 0x485   :  { %v533_v48 = vrot.slane %v532_v46, 2  ;;  %v526_v49 = vrot.slane %v525_v47, 2  ;;  %s573_s15 = sshll.u32 %s858_s13, 4  ;;  %s582_s17 = sshll.u32 %s859_s6, 4  ;;  %s574_s15 = int_to_ptr.vmem [resolvable:$true] %s573_s15  ;;  %s1020_s17 = int_to_ptr.vmem [resolvable:$true] %s582_s17 }
 0x486   :  { %s800_s8 = scalar_lea.vmem %s574_s15, 32  ;;  %p805_p5 = scmp.lt.s32.totalorder %s574_s15, %s574_s15 }
 0x487   :  { %v534_v50 = vadd.f32 %v533_v48, %v532_v46  ;;  %v527_v51 = vadd.f32 %v526_v49, %v525_v47  ;;  %p801_p4 = scmp.ne.s32.totalorder %s574_s15, %s800_s8  ;;  %p806_p6 = scmp.lt.s32.totalorder %s800_s8, %s800_s8 }
 0x489   :  { %v535_v52 = vrot.slane %v534_v50, 1  ;;  %v528_v53 = vrot.slane %v527_v51, 1  ;;  %p807_p7 = por %p806_p6, %p805_p5 }
 0x48b   :  { %v536_v54 = vadd.f32 %v535_v52, %v534_v50  ;;  %v529_v56 = vadd.f32 %v528_v53, %v527_v51  ;;  %p808_p8 = pnand %p807_p7, %p801_p4 }
 0x48d   :  { %v539_v57 = vmul.f32 0.125, %v536_v54  ;;  %v538_v60 = vmul.f32 0.125, %v529_v56 }
 0x48f   :  { %v552_v62 = vadd.f32 %v550_v58, %v539_v57  ;;  %v551_v63 = vadd.f32 %v549_v61, %v538_v60  ;;  %v543_v0 = vsel %vm542_vm6, %v539_v57, %v538_v60 }
 0x490   :  { %546 = vst.msk [vmem:[#allocation9] sm:$0x3] %vm545_vm7, %v543_v0 }
 0x491   :  { %554 = vst.msk [vmem:[#allocation11 + $0x8] sm:$0xff] %vm171_vm2, %v552_v62  ;;  %553 = vst.msk [vmem:[#allocation11] sm:$0xff] %vm171_vm2, %v551_v63 }
 0x492   :  { %811 = shalt.err (!%p808_p8)
}
 0x493   :  { %s812_s0 = scalar_lea.hbm %s1065_s9, 32 }
 0x494   :  { %p813_p9 = scmp.ne.s32.totalorder %s1065_s9, %s812_s0  ;;  %p816_p10 = scmp.lt.u32.totalorder %s812_s0, %s1065_s9 }
 0x496   :  { %p818_p11 = pnand %p816_p10, %p813_p9 }
 0x498   :  { %821 = shalt.err (!%p818_p11)
}
 0x499   :  { %576 = dma.vmem_to_hbm [thread:$0]  %s574_s15, 32, %s1065_s9, [#allocation10]  }
 0x49a   :  { %s822_s23 = scalar_lea.vmem %s1020_s17, 256  ;;  %p827_p13 = scmp.lt.s32.totalorder %s1020_s17, %s1020_s17 }
 0x49b   :  { %p823_p12 = scmp.ne.s32.totalorder %s1020_s17, %s822_s23  ;;  %p828_p0 = scmp.lt.s32.totalorder %s822_s23, %s822_s23 }
 0x49d   :  { %p829_p1 = por %p828_p0, %p827_p13 }
 0x49f   :  { %p830_p2 = pnand %p829_p1, %p823_p12 }
 0x4a1   :  { %833 = shalt.err (!%p830_p2)
}
 0x4a2   :  { %s834_s26 = scalar_lea.hbm %s1066_s10, 256 }
 0x4a3   :  { %p835_p3 = scmp.ne.s32.totalorder %s1066_s10, %s834_s26  ;;  %p838_p4 = scmp.lt.u32.totalorder %s834_s26, %s1066_s10 }
 0x4a5   :  { %p840_p5 = pnand %p838_p4, %p835_p3 }
 0x4a7   :  { %843 = shalt.err (!%p840_p5)
}
 0x4a8   :  { %588 = dma.vmem_to_hbm [thread:$0]  %s1020_s17, 256, %s1066_s10, [#allocation10], %s854_s2, %s854_s2, %s855_s14  }
 0x4a9   :  { %848 = dma.done.wait [#allocation4], 256  }
 0x4aa   :  { %849 = vsyncadd [#allocation4], 4294967040 }
 0x4ab   :  { %850 = dma.done.wait [#allocation10], 288  }
 0x4ac   :  { %851 = vsyncadd [#allocation10], 4294967008 }
 0x4ad   :  { %598 = vsyncpa [#allocation3], 1 }
 0x4ae   :  { %599 = vsyncpa [#allocation6], 1 }
 0x4af   :  { %600 = vsyncpa [#allocation4], 1 }
 0x4b0   :  { %601 = vsyncpa [#allocation10], 1 }

</bundles_post_ra>
